<compile_context>
chip_gen: v6e
topology: v6e:2x2x1
jax: 0.10.0
libtpu: 0.0.40
codegen_flags: <defaults>
</compile_context>

<pallas_src>
import functools
import math

import jax
import jax.numpy as jnp
from jax import lax
from jax.experimental import pallas as pl
from jax.experimental.pallas import tpu as pltpu

_MASK = -1e30  # big-negative finite fill for padded kv columns (avoids inf-inf NaNs)


def _round_up(x: int, m: int) -> int:
    return ((x + m - 1) // m) * m


def _bf16_exp_default() -> bool:
    """exp in bf16 only where the EUP supports it (v6e / v7x); f32 elsewhere (v5e etc.)."""
    try:
        kind = jax.devices()[0].device_kind.lower()
    except Exception:
        return False
    return any(t in kind for t in ("v6", "v7", "tpu7", "trillium"))


def _store_packed(o_ref, o):
    """Write (G, tq, dv) f32 into the lane-dense (1, tq, G*dv) output block."""
    g, _, dv = o.shape
    if g == 1:
        o_ref[0] = o[0].astype(o_ref.dtype)
    else:
        for h in range(g):  # static loop, static lane slices
            o_ref[0, :, h * dv:(h + 1) * dv] = o[h].astype(o_ref.dtype)


def _attn_onepass_kernel(q_ref, k_ref, v_ref, o_ref, *, scale, kv_len, bf16_exp):
    """K/V fully resident: one-pass softmax per (head-group, q-tile)."""
    # q: (G, tq, d)   k: (G, Lk, d)   v: (G, Lk, dv)   o: (1, tq, G*dv)
    q = q_ref[...] * scale          # fold 1/sqrt(D) into the small q tile (stays bf16)
    k = k_ref[...]
    v = v_ref[...]
    s = jnp.einsum("gqd,gkd->gqk", q, k, preferred_element_type=jnp.float32)
    if kv_len is not None:          # static flag: kv padding present -> mask tail cols
        cols = lax.broadcasted_iota(jnp.int32, s.shape, 2)
        s = jnp.where(cols < kv_len, s, _MASK)
    m = jnp.max(s, axis=-1, keepdims=True)           # (G, tq, 1) f32
    x = s - m
    if bf16_exp:                                     # v6e/v7x: 2x EUP throughput
        x = x.astype(jnp.bfloat16)
    p = jnp.exp(x)
    l = jnp.sum(p.astype(jnp.float32), axis=-1, keepdims=True)
    o = jnp.einsum("gqk,gkd->gqd", p.astype(v.dtype), v,
                   preferred_element_type=jnp.float32)
    o = o * pl.reciprocal(l, approx=True)
    _store_packed(o_ref, o)


def _attn_flash_kernel(q_ref, k_ref, v_ref, o_ref, m_scr, l_scr, acc_scr, *,
                       scale, kv_len, bf16_exp):
    """Flash-style online softmax over kv tiles (fallback for long kv)."""
    j = pl.program_id(2)

    @pl.when(j == 0)
    def _():
        m_scr[...] = jnp.full_like(m_scr, -jnp.inf)
        l_scr[...] = jnp.zeros_like(l_scr)
        acc_scr[...] = jnp.zeros_like(acc_scr)

    q = q_ref[...] * scale
    k = k_ref[...]
    v = v_ref[...]
    s = jnp.einsum("gqd,gkd->gqk", q, k, preferred_element_type=jnp.float32)
    if kv_len is not None:
        tk = k.shape[1]
        cols = j * tk + lax.broadcasted_iota(jnp.int32, s.shape, 2)
        s = jnp.where(cols < kv_len, s, _MASK)

    m_prev = m_scr[...]
    m_new = jnp.maximum(m_prev, jnp.max(s, axis=-1, keepdims=True))
    alpha = jnp.exp(m_prev - m_new)
    x = s - m_new
    if bf16_exp:
        x = x.astype(jnp.bfloat16)
    p = jnp.exp(x)
    l_scr[...] = alpha * l_scr[...] + jnp.sum(p.astype(jnp.float32), axis=-1, keepdims=True)
    acc_scr[...] = alpha * acc_scr[...] + jnp.einsum(
        "gqk,gkd->gqd", p.astype(v.dtype), v, preferred_element_type=jnp.float32)
    m_scr[...] = m_new

    @pl.when(j == pl.num_programs(2) - 1)
    def _():
        o = acc_scr[...] * pl.reciprocal(l_scr[...], approx=True)
        _store_packed(o_ref, o)


def attention(q, k, v, *, block_q=256, block_k=1024, kv_resident=4096, bf16_exp=None):
    """softmax(q @ k^T / sqrt(D)) @ v over the last two dims of (..., L, D) inputs.

    Equivalent to the PyTorch `Attention.forward` with mask=None.
    """
    # TODO(synk): optional boolean attn_mask (masked_fill with -inf) path not implemented.
    *lead, lq, d = q.shape
    lk = k.shape[-2]
    dv = v.shape[-1]
    if lq == 0 or lk == 0:
        return jnp.zeros((*q.shape[:-1], dv), q.dtype)

    if bf16_exp is None:
        bf16_exp = _bf16_exp_default()

    block_q = max(8, _round_up(block_q, 8))
    block_k = max(128, _round_up(block_k, 128))

    bh = math.prod(lead) if lead else 1
    qf = q.reshape(bh, lq, d)
    kf = k.reshape(bh, lk, d)
    vf = v.reshape(bh, lk, dv)

    # Heads per block so the output block is >= 128 lanes wide (unmasked, dense writes).
    if dv < 128 and 128 % dv == 0:
        G = min(128 // dv, 8)
        while G > 1 and bh % G:
            G //= 2
    else:
        G = 1

    # q tiling (multiple of 8 sublanes); pad lq up to the tile.
    tq = min(block_q, _round_up(lq, 8))
    lq_pad = _round_up(lq, tq)
    # v7x megacore: try to keep the parallel grid extent >= 2 by splitting q tiles.
    while (bh // G) * (lq_pad // tq) < 2 and tq > 8 and tq % 16 == 0:
        tq //= 2

    # kv tiling: hold K/V fully resident per head group when they (and the f32
    # similarity slab) comfortably fit VMEM; otherwise flash-style kv tiles.
    itemsize = jnp.dtype(q.dtype).itemsize
    lk_res = _round_up(lk, 128)
    resident_bytes = (2 * G * tq * lk_res * 4                   # f32 s and p slabs
                      + 2 * G * lk_res * (d + dv) * itemsize)   # double-buffered K+V
    one_pass = (lk_res <= kv_resident) and (resident_bytes <= 24 * 1024 * 1024)
    tk = lk_res if one_pass else block_k
    lk_pad = _round_up(lk, tk)
    n_k = lk_pad // tk

    # Pad sequences up to the tiles; padded kv columns are masked in-kernel.
    if lq_pad != lq:
        qf = jnp.pad(qf, ((0, 0), (0, lq_pad - lq), (0, 0)))
    if lk_pad != lk:
        kf = jnp.pad(kf, ((0, 0), (0, lk_pad - lk), (0, 0)))
        vf = jnp.pad(vf, ((0, 0), (0, lk_pad - lk), (0, 0)))
    kv_len = lk if lk_pad != lk else None

    scale = float(d) ** -0.5
    n_q = lq_pad // tq
    nbg = bh // G
    out_shape = jax.ShapeDtypeStruct((nbg, lq_pad, G * dv), q.dtype)

    if one_pass:
        kernel = functools.partial(_attn_onepass_kernel, scale=scale,
                                   kv_len=kv_len, bf16_exp=bf16_exp)
        grid = (nbg, n_q)
        in_specs = [
            pl.BlockSpec((G, tq, d), lambda b, i: (b, i, 0)),
            pl.BlockSpec((G, lk_pad, d), lambda b, i: (b, 0, 0)),    # resident across q tiles
            pl.BlockSpec((G, lk_pad, dv), lambda b, i: (b, 0, 0)),   # resident across q tiles
        ]
        out_specs = pl.BlockSpec((1, tq, G * dv), lambda b, i: (b, i, 0))
        scratch_shapes = []
        dim_sem = ("parallel", "parallel")
    else:
        kernel = functools.partial(_attn_flash_kernel, scale=scale,
                                   kv_len=kv_len, bf16_exp=bf16_exp)
        grid = (nbg, n_q, n_k)
        in_specs = [
            pl.BlockSpec((G, tq, d), lambda b, i, j: (b, i, 0)),
            pl.BlockSpec((G, tk, d), lambda b, i, j: (b, j, 0)),
            pl.BlockSpec((G, tk, dv), lambda b, i, j: (b, j, 0)),
        ]
        out_specs = pl.BlockSpec((1, tq, G * dv), lambda b, i, j: (b, i, 0))
        scratch_shapes = [
            pltpu.VMEM((G, tq, 1), jnp.float32),    # running max m
            pltpu.VMEM((G, tq, 1), jnp.float32),    # running denom l
            pltpu.VMEM((G, tq, dv), jnp.float32),   # running numerator acc
        ]
        dim_sem = ("parallel", "parallel", "arbitrary")

    out = pl.pallas_call(
        kernel,
        out_shape=out_shape,
        grid_spec=pltpu.PrefetchScalarGridSpec(
            num_scalar_prefetch=0,
            grid=grid,
            in_specs=in_specs,
            out_specs=out_specs,
            scratch_shapes=scratch_shapes,
        ),
        compiler_params=pltpu.CompilerParams(
            dimension_semantics=dim_sem,
            vmem_limit_bytes=48 * 1024 * 1024,   # stay under v7x's 64 MiB VMEM
        ),
    )(qf, kf, vf)

    # Un-interleave the lane-packed heads and drop padding.
    if G > 1:
        out = out.reshape(nbg, lq_pad, G, dv)
        out = jnp.swapaxes(out, 1, 2).reshape(bh, lq_pad, dv)
    else:
        out = out.reshape(bh, lq_pad, dv)
    out = out[:, :lq]
    return out.reshape(*lead, lq, dv)


def _reference(q, k, v):
    qf, kf, vf = (x.astype(jnp.float32) for x in (q, k, v))
    s = jnp.einsum("...id,...jd->...ij", qf, kf) * (q.shape[-1] ** -0.5)
    attn = jax.nn.softmax(s, axis=-1)
    return jnp.einsum("...ij,...jd->...id", attn, vf)


if __name__ == "__main__":
    # 1) Small LightGlue-like shapes: batch=2, heads=4, q_len=8, kv_len=16, head_dim=32.
    B, H, LQ, LK, D = 2, 4, 8, 16, 32
    kq, kk_, kv_ = jax.random.split(jax.random.PRNGKey(0), 3)
    q = jax.random.normal(kq, (B, H, LQ, D), jnp.float32).astype(jnp.bfloat16)
    k = jax.random.normal(kk_, (B, H, LK, D), jnp.float32).astype(jnp.bfloat16)
    v = jax.random.normal(kv_, (B, H, LK, D), jnp.float32).astype(jnp.bfloat16)
    out = attention(q, k, v)
    jax.block_until_ready(out)
    ref = _reference(q, k, v)
    assert out.shape == ref.shape
    err = float(jnp.max(jnp.abs(out.astype(jnp.float32) - ref)))
    assert err < 6e-2, f"resident path max abs err {err}"

    # 2) Larger case: resident K/V, multiple q tiles, head-pair lane packing (dv=64 -> 128 lanes).
    B2, H2, L2, D2 = 1, 2, 256, 64
    kq2, kk2, kv2 = jax.random.split(jax.random.PRNGKey(1), 3)
    q2 = jax.random.normal(kq2, (B2, H2, L2, D2), jnp.float32).astype(jnp.bfloat16)
    k2 = jax.random.normal(kk2, (B2, H2, L2, D2), jnp.float32).astype(jnp.bfloat16)
    v2 = jax.random.normal(kv2, (B2, H2, L2, D2), jnp.float32).astype(jnp.bfloat16)
    out2 = attention(q2, k2, v2)
    jax.block_until_ready(out2)
    err2 = float(jnp.max(jnp.abs(out2.astype(jnp.float32) - _reference(q2, k2, v2))))
    assert err2 < 6e-2, f"resident multi-q-tile max abs err {err2}"

    # 3) Flash (kv-tiled online-softmax) fallback path.
    out3 = attention(q2, k2, v2, block_q=128, block_k=128, kv_resident=0)
    jax.block_until_ready(out3)
    err3 = float(jnp.max(jnp.abs(out3.astype(jnp.float32) - _reference(q2, k2, v2))))
    assert err3 < 6e-2, f"flash path max abs err {err3}"

    # 4) Non-multiple sequence lengths (padding + kv masking path).
    B4, H4, LQ4, LK4, D4 = 1, 2, 200, 300, 64
    kq4, kk4, kv4 = jax.random.split(jax.random.PRNGKey(2), 3)
    q4 = jax.random.normal(kq4, (B4, H4, LQ4, D4), jnp.float32).astype(jnp.bfloat16)
    k4 = jax.random.normal(kk4, (B4, H4, LK4, D4), jnp.float32).astype(jnp.bfloat16)
    v4 = jax.random.normal(kv4, (B4, H4, LK4, D4), jnp.float32).astype(jnp.bfloat16)
    out4 = attention(q4, k4, v4)
    jax.block_until_ready(out4)
    err4 = float(jnp.max(jnp.abs(out4.astype(jnp.float32) - _reference(q4, k4, v4))))
    assert err4 < 6e-2, f"padded/masked path max abs err {err4}"

    # 5) Zero-length edge case from the PyTorch module.
    z = attention(q[:, :, :0], k, v)
    assert z.shape == (B, H, 0, D)

    print("KERNEL_OK")
</pallas_src>

<mosaic_0001>
module attributes {stable_mosaic.version = 11 : i64} {
  func.func @_attn_onepass_kernel(%arg0: i32, %arg1: i32, %arg2: memref<4x8x32xbf16, #tpu.memory_space<vmem>>, %arg3: memref<4x128x32xbf16, #tpu.memory_space<vmem>>, %arg4: memref<4x128x32xbf16, #tpu.memory_space<vmem>>, %arg5: memref<1x8x128xbf16, #tpu.memory_space<vmem>>) attributes {dimension_semantics = [#tpu.dimension_semantics<parallel>, #tpu.dimension_semantics<parallel>], iteration_bounds = array<i64: 2, 1>, scalar_prefetch = 0 : i64, scratch_operands = 0 : i64, tpu.core_type = #tpu.core_type<tc>, window_params = [{transform_indices = @transform_0, window_bounds = array<i64: 4, 8, 32>}, {transform_indices = @transform_1, window_bounds = array<i64: 4, 128, 32>}, {transform_indices = @transform_2, window_bounds = array<i64: 4, 128, 32>}, {transform_indices = @transform_3, window_bounds = array<i64: 1, 8, 128>}]} {
    %c0 = arith.constant 0 : index
    %c0_0 = arith.constant 0 : index
    %c0_1 = arith.constant 0 : index
    %0 = vector.load %arg2[%c0, %c0_0, %c0_1] : memref<4x8x32xbf16, #tpu.memory_space<vmem>>, vector<4x8x32xbf16>
    %cst = arith.constant 1.767580e-01 : bf16
    %1 = vector.broadcast %cst : bf16 to vector<4x8x32xbf16>
    %2 = arith.mulf %0, %1 : vector<4x8x32xbf16>
    %c0_2 = arith.constant 0 : index
    %c0_3 = arith.constant 0 : index
    %c0_4 = arith.constant 0 : index
    %3 = vector.load %arg3[%c0_2, %c0_3, %c0_4] : memref<4x128x32xbf16, #tpu.memory_space<vmem>>, vector<4x128x32xbf16>
    %c0_5 = arith.constant 0 : index
    %c0_6 = arith.constant 0 : index
    %c0_7 = arith.constant 0 : index
    %4 = vector.load %arg4[%c0_5, %c0_6, %c0_7] : memref<4x128x32xbf16, #tpu.memory_space<vmem>>, vector<4x128x32xbf16>
    "tpu.trace_start"() <{level = 10 : i32, message = "gqd,gkd->gqk"}> : () -> ()
    %cst_8 = arith.constant dense<0.000000e+00> : vector<4x8x128xf32>
    %5 = tpu.matmul %2, %3, %cst_8 {dimension_numbers = #tpu.dot_dimension_numbers<[2], [2], [1], [1], [0, 0, 0, 1, 1, 1], [0], [0]>} : vector<4x8x32xbf16>, vector<4x128x32xbf16>, vector<4x8x128xf32> -> vector<4x8x128xf32>
    "tpu.trace_stop"() : () -> ()
    %6 = tpu.iota {dimensions = array<i32: 2>} : vector<4x8x128xi32>
    %c16_i32 = arith.constant 16 : i32
    %7 = vector.broadcast %c16_i32 : i32 to vector<4x8x128xi32>
    %8 = arith.cmpi slt, %6, %7 : vector<4x8x128xi32>
    %cst_9 = arith.constant -1.000000e+30 : f32
    %9 = vector.broadcast %cst_9 : f32 to vector<4x8x128xf32>
    %10 = arith.select %8, %5, %9 : vector<4x8x128xi1>, vector<4x8x128xf32>
    %cst_10 = arith.constant dense<0xFF800000> : vector<4x8xf32>
    %11 = vector.multi_reduction <maximumf>, %10, %cst_10 [2] : vector<4x8x128xf32> to vector<4x8xf32>
    %12 = vector.shape_cast %11 : vector<4x8xf32> to vector<4x8x1xf32>
    %13 = vector.broadcast %12 : vector<4x8x1xf32> to vector<4x8x128xf32>
    %14 = arith.subf %10, %13 : vector<4x8x128xf32>
    %15 = math.exp %14 : vector<4x8x128xf32>
    %cst_11 = arith.constant dense<0.000000e+00> : vector<4x8xf32>
    %16 = vector.multi_reduction <add>, %15, %cst_11 [2] : vector<4x8x128xf32> to vector<4x8xf32>
    %17 = vector.shape_cast %16 : vector<4x8xf32> to vector<4x8x1xf32>
    %18 = arith.truncf %15 : vector<4x8x128xf32> to vector<4x8x128xbf16>
    "tpu.trace_start"() <{level = 10 : i32, message = "gqk,gkd->gqd"}> : () -> ()
    %cst_12 = arith.constant dense<0.000000e+00> : vector<4x8x32xf32>
    %19 = tpu.matmul %18, %4, %cst_12 {dimension_numbers = #tpu.dot_dimension_numbers<[2], [1], [1], [2], [0, 0, 0, 1, 1, 2], [0], [0]>} : vector<4x8x128xbf16>, vector<4x128x32xbf16>, vector<4x8x32xf32> -> vector<4x8x32xf32>
    "tpu.trace_stop"() : () -> ()
    %20 = tpu.reciprocal %17 {approx = true} : vector<4x8x1xf32> -> vector<4x8x1xf32>
    %21 = vector.broadcast %20 : vector<4x8x1xf32> to vector<4x8x32xf32>
    %22 = arith.mulf %19, %21 : vector<4x8x32xf32>
    %23 = vector.extract_strided_slice %22 {offsets = [0, 0, 0], sizes = [1, 8, 32], strides = [1, 1, 1]} : vector<4x8x32xf32> to vector<1x8x32xf32>
    %24 = vector.shape_cast %23 : vector<1x8x32xf32> to vector<8x32xf32>
    %25 = arith.truncf %24 : vector<8x32xf32> to vector<8x32xbf16>
    %c0_13 = arith.constant 0 : index
    %c0_14 = arith.constant 0 : index
    %c0_15 = arith.constant 0 : index
    %26 = vector.load %arg5[%c0_13, %c0_14, %c0_15] : memref<1x8x128xbf16, #tpu.memory_space<vmem>>, vector<1x8x32xbf16>
    %27 = vector.shape_cast %26 : vector<1x8x32xbf16> to vector<8x32xbf16>
    %28 = vector.shape_cast %25 : vector<8x32xbf16> to vector<1x8x32xbf16>
    tpu.vector_store %arg5[%c0_13, %c0_14, %c0_15], %28 {strides = array<i32>} : memref<1x8x128xbf16, #tpu.memory_space<vmem>>, vector<1x8x32xbf16>,
    %29 = vector.extract_strided_slice %22 {offsets = [1, 0, 0], sizes = [1, 8, 32], strides = [1, 1, 1]} : vector<4x8x32xf32> to vector<1x8x32xf32>
    %30 = vector.shape_cast %29 : vector<1x8x32xf32> to vector<8x32xf32>
    %31 = arith.truncf %30 : vector<8x32xf32> to vector<8x32xbf16>
    %c0_16 = arith.constant 0 : index
    %c0_17 = arith.constant 0 : index
    %c32 = arith.constant 32 : index
    %32 = vector.load %arg5[%c0_16, %c0_17, %c32] : memref<1x8x128xbf16, #tpu.memory_space<vmem>>, vector<1x8x32xbf16>
    %33 = vector.shape_cast %32 : vector<1x8x32xbf16> to vector<8x32xbf16>
    %34 = vector.shape_cast %31 : vector<8x32xbf16> to vector<1x8x32xbf16>
    tpu.vector_store %arg5[%c0_16, %c0_17, %c32], %34 {strides = array<i32>} : memref<1x8x128xbf16, #tpu.memory_space<vmem>>, vector<1x8x32xbf16>,
    %35 = vector.extract_strided_slice %22 {offsets = [2, 0, 0], sizes = [1, 8, 32], strides = [1, 1, 1]} : vector<4x8x32xf32> to vector<1x8x32xf32>
    %36 = vector.shape_cast %35 : vector<1x8x32xf32> to vector<8x32xf32>
    %37 = arith.truncf %36 : vector<8x32xf32> to vector<8x32xbf16>
    %c0_18 = arith.constant 0 : index
    %c0_19 = arith.constant 0 : index
    %c64 = arith.constant 64 : index
    %38 = vector.load %arg5[%c0_18, %c0_19, %c64] : memref<1x8x128xbf16, #tpu.memory_space<vmem>>, vector<1x8x32xbf16>
    %39 = vector.shape_cast %38 : vector<1x8x32xbf16> to vector<8x32xbf16>
    %40 = vector.shape_cast %37 : vector<8x32xbf16> to vector<1x8x32xbf16>
    tpu.vector_store %arg5[%c0_18, %c0_19, %c64], %40 {strides = array<i32>} : memref<1x8x128xbf16, #tpu.memory_space<vmem>>, vector<1x8x32xbf16>,
    %41 = vector.extract_strided_slice %22 {offsets = [3, 0, 0], sizes = [1, 8, 32], strides = [1, 1, 1]} : vector<4x8x32xf32> to vector<1x8x32xf32>
    %42 = vector.shape_cast %41 : vector<1x8x32xf32> to vector<8x32xf32>
    %43 = arith.truncf %42 : vector<8x32xf32> to vector<8x32xbf16>
    %c0_20 = arith.constant 0 : index
    %c0_21 = arith.constant 0 : index
    %c96 = arith.constant 96 : index
    %44 = vector.load %arg5[%c0_20, %c0_21, %c96] : memref<1x8x128xbf16, #tpu.memory_space<vmem>>, vector<1x8x32xbf16>
    %45 = vector.shape_cast %44 : vector<1x8x32xbf16> to vector<8x32xbf16>
    %46 = vector.shape_cast %43 : vector<8x32xbf16> to vector<1x8x32xbf16>
    tpu.vector_store %arg5[%c0_20, %c0_21, %c96], %46 {strides = array<i32>} : memref<1x8x128xbf16, #tpu.memory_space<vmem>>, vector<1x8x32xbf16>,
    return
  }
  func.func @transform_0(%arg0: i32, %arg1: i32) -> (i32, i32, i32) {
    %c0_i32 = arith.constant 0 : i32
    %c0_i32_0 = arith.constant 0 : i32
    return %arg0, %arg1, %c0_i32 : i32, i32, i32
  }
  func.func @transform_1(%arg0: i32, %arg1: i32) -> (i32, i32, i32) {
    %c0_i32 = arith.constant 0 : i32
    %c0_i32_0 = arith.constant 0 : i32
    %c0_i32_1 = arith.constant 0 : i32
    return %arg0, %c0_i32, %c0_i32_0 : i32, i32, i32
  }
  func.func @transform_2(%arg0: i32, %arg1: i32) -> (i32, i32, i32) {
    %c0_i32 = arith.constant 0 : i32
    %c0_i32_0 = arith.constant 0 : i32
    %c0_i32_1 = arith.constant 0 : i32
    return %arg0, %c0_i32, %c0_i32_0 : i32, i32, i32
  }
  func.func @transform_3(%arg0: i32, %arg1: i32) -> (i32, i32, i32) {
    %c0_i32 = arith.constant 0 : i32
    %c0_i32_0 = arith.constant 0 : i32
    return %arg0, %arg1, %c0_i32 : i32, i32, i32
  }
}

</mosaic_0001>

<bundles_post_ra>
// kernel: tpu_custom_call.1
= control target key start
LH: loop header
LB: loop body
LE: loop exit
PB: predicated region body
PF: predicated region fallthrough
CT: control target
= control target key end

     0   :  { %8 = vsyncpa [#allocation3], 0  ;;  %s2258_s0 = inlined_call_operand.vmem [shape: bf16[8,8,32], index: 0, kind: input, shape index: {}]   ;;  %s2259_s1 = inlined_call_operand.vmem [shape: bf16[8,128,32], index: 1, kind: input, shape index: {}]   ;;  %s2260_s2 = inlined_call_operand.vmem [shape: bf16[8,128,32], index: 2, kind: input, shape index: {}]   ;;  %s2261_s3 = inlined_call_operand.hbm [shape: bf16[2,8,128], index: 3, kind: output, shape index: {}]  }
   0x1   :  { %10 = vsyncpa [#allocation3 + $0x1], 0  ;;  %s1922_s12 = smov 0   ;;  %s1924_s13 = smov 0  }
   0x2   :  { %s1926_s14 = smov 0   ;;  %s1928_s15 = smov 0  }
   0x3   :  { %s1930_s16 = smov 0   ;;  %s1932_s17 = smov 0  }
   0x4 LB: > { %s1352_s18 = sadd.s32 4294967295, %s1894_s17   ;;  %s1353_s19 = sadd.s32 4294967294, %s1894_s17   ;;  %s1894_s17 = sphi %s1932_s17, %s16_s17   ;;  %s1890_s16 = sphi %s1930_s16, %s2268_s16   ;;  %s1886_s15 = sphi %s1928_s15, %s2267_s15   ;;  %s1882_s14 = sphi %s1926_s14, %s2266_s14   ;;  %s1878_s13 = sphi %s1924_s13, %s2265_s13   ;;  %s1874_s12 = sphi %s1922_s12, %s2264_s12  }
   0x5   : > { %s28_s20 = sadd.s32 1, %s1890_s16  ;;  %s117_s21 = sadd.s32 1, %s1882_s14 }
   0x6   : > { %p30_p0 = scmp.ge.s32.totalorder %s28_s20, 2  ;;  %p127_p1 = scmp.ne.s32.totalorder %s1882_s14, %s1878_s13 }
   0x7   : > { %p128_p2 = scmp.eq.s32.totalorder %s1352_s18, 1  ;;  %p133_p3 = scmp.ne.s32.totalorder %s1878_s13, %s1874_s12 }
   0x8   : > { %s2270_s20 = smov (%p30_p0, %s28_s20), 0  ;;  %p134_p5 = scmp.eq.s32.totalorder %s1353_s19, 1 }
   0x9   : > { %p1962_p4 = por %p128_p2, %p127_p1  ;;  %s112_s23 = ssub.s32 %s1890_s16, %s2270_s20 }
   0xa   : > { %p1356_p6 = scmp.ge.s32.totalorder %s1894_s17, 1  ;;  %p115_p7 = scmp.eq.s32.totalorder %s112_s23, 0 }
   0xb   : > { %p1969_p8 = por %p134_p5, %p133_p3  ;;  %p184_p9 = scmp.lt.s32.totalorder %s1894_s17, 3 }
   0xc   : > { %s1975_s25 = scalar_select %p115_p7, %s1882_s14, %s117_s21  }
   0xd   : > { %p185_p10 = pnand %p1356_p6, %p184_p9 }
   0xe   : > { %s1358_s26 = sshll.u32 (!%p185_p10), %s1886_s15, 2  ;;  %s1898_s11 = smov (!%p185_p10), 32  }
   0xf   : > { %188 = sbr.rel (%p185_p10) target bundleno = 833 (0x341), region = 32  ;;  %p224_p11 = scmp.lt.s32.totalorder (!%p185_p10), %s1358_s26, 7 }
  0x10   : > { %s220_s18 = sand.u32 (!%p185_p10), 1, %s1878_s13   ;;  %s1899_s23 = smov (!%p185_p10), 64  }
  0x11   : > { %s1357_s19 = sshll.u32 (!%p185_p10), %s220_s18, 2  ;;  %s1243_s5 = scalar_lea.sflag (!%p185_p10), [#allocation3], %s220_s18 }
  0x12   : > { %s2205_s21 = scalar_lea.vmem (!%p185_p10), [#allocation2], %s1357_s19 }
  0x13   : > { %s1257_s28 = sshll.u32 (!%p185_p10), %s2205_s21, 4  ;;  %s1258_s28 = int_to_ptr.vmem [resolvable:$true] %s1257_s28 }
  0x14   : > { %v1896_v0 = vmov 0.0   ;;  %vm1897_vm0 = vmmov 0   ;;  %s2272_s26 = smov (!%p224_p11, %s1358_s26), 7  ;;  %vm424_vm1 = vcmask 261120   ;;  %vm1213_vm3 = vcmask 257024  }
  0x15   : > { %1518 = vmatprep.subr.bf16.mxu0 %v1896_v0  ;;  %1538 = vmatprep.subr.bf16.mxu1 %v1896_v0  ;;  %s1441_s27 = sshll.u32 %s2272_s26, 6  ;;  %s1359_s7 = sshll.u32 %s2272_s26, 2  ;;  %vm1222_vm4 = vcmask 519424   ;;  %vm1231_vm5 = vcmask 781824   ;;  %vm1240_vm6 = vcmask 1044224  }
  0x16   : > { %1534 = vmatprep.mubr.msk.bf16.mxu0 %vm1897_vm0, %v1896_v0  ;;  %1554 = vmatprep.mubr.msk.bf16.mxu1 %vm1897_vm0, %v1896_v0  ;;  %s1992_s30 = scalar_lea.vmem %s2259_s1, %s1441_s27  ;;  %s2030_s6 = scalar_lea.vmem %s2260_s2, %s1441_s27 }
  0x17   : > { %v1738_v1 = vld [vmem:[%s1992_s30 + $0x38] sm:$0xff]   ;;  %v1740_v5 = vld [vmem:[%s1992_s30 + $0x30] sm:$0xff]   ;;  %v1742_v9 = vld [vmem:[%s1992_s30 + $0x28] sm:$0xff]   ;;  %s2050_s10 = scalar_lea.vmem %s2258_s0, %s1359_s7  ;;  %s1900_s26 = smov 96  }
  0x18   : > { %v1739_v2 = vld [vmem:[%s1992_s30 + $0x78] sm:$0xff]   ;;  %v450_v3 = vsel %vm424_vm1, %v1738_v1, 0  ;;  %v1741_v6 = vld [vmem:[%s1992_s30 + $0x70] sm:$0xff]   ;;  %v447_v7 = vsel %vm424_vm1, %v1740_v5, 0  ;;  %v1743_v10 = vld [vmem:[%s1992_s30 + $0x68] sm:$0xff]   ;;  %v444_v11 = vsel %vm424_vm1, %v1742_v9, 0 }
  0x19   : > { %1519 = vmatpush3.bf16.xpose.msra.mxu0 %v450_v3  ;;  %v557_v4 = vsel %vm424_vm1, %v1739_v2, 0  ;;  %v554_v8 = vsel %vm424_vm1, %v1741_v6, 0  ;;  %v551_v12 = vsel %vm424_vm1, %v1743_v10, 0  ;;  %v1744_v13 = vld [vmem:[%s1992_s30 + $0x20] sm:$0xff]   ;;  %v1746_v17 = vld [vmem:[%s1992_s30 + $0x18] sm:$0xff]   ;;  %v1748_v19 = vld [vmem:[%s1992_s30 + $0x10] sm:$0xff]  }
  0x1a   : > { %1539 = vmatpush3.bf16.xpose.msra.mxu1 %v557_v4  ;;  %1520 = vmatprep.subr.bf16.mxu0 %v1896_v0  ;;  %v1745_v14 = vld [vmem:[%s1992_s30 + $0x60] sm:$0xff]   ;;  %v441_v15 = vsel %vm424_vm1, %v1744_v13, 0  ;;  %v1747_v18 = vld [vmem:[%s1992_s30 + $0x58] sm:$0xff]   ;;  %v1749_v20 = vld [vmem:[%s1992_s30 + $0x50] sm:$0xff]   ;;  %v438_v23 = vsel %vm424_vm1, %v1746_v17, 0  ;;  %v435_v25 = vsel %vm424_vm1, %v1748_v19, 0 }
  0x1b   : > { %1540 = vmatprep.subr.bf16.mxu1 %v1896_v0  ;;  %v548_v16 = vsel %vm424_vm1, %v1745_v14, 0  ;;  %v1750_v21 = vld [vmem:[%s1992_s30 + $0x8] sm:$0xff]   ;;  %v545_v24 = vsel %vm424_vm1, %v1747_v18, 0  ;;  %v542_v26 = vsel %vm424_vm1, %v1749_v20, 0  ;;  %v1752_v29 = vld [vmem:[%s1992_s30] sm:$0xff]   ;;  %v1754_v35 = vld [vmem:[%s1992_s30 + $0xb8] sm:$0xff]  }
  0x1c   : > { %v1751_v22 = vld [vmem:[%s1992_s30 + $0x48] sm:$0xff]   ;;  %v432_v27 = vsel %vm424_vm1, %v1750_v21, 0  ;;  %v1753_v30 = vld [vmem:[%s1992_s30 + $0x40] sm:$0xff]   ;;  %v429_v31 = vsel %vm424_vm1, %v1752_v29, 0  ;;  %v1755_v36 = vld [vmem:[%s1992_s30 + $0xf8] sm:$0xff]   ;;  %v664_v39 = vsel %vm424_vm1, %v1754_v35, 0 }
  0x1d   : > { %v539_v28 = vsel %vm424_vm1, %v1751_v22, 0  ;;  %v536_v32 = vsel %vm424_vm1, %v1753_v30, 0  ;;  %v248_v33 = vld [vmem:[%s2050_s10] sm:$0xf]  ;;  %v249_v34 = vld [vmem:[%s2050_s10 + $0x4] sm:$0xf] }
  0x1e   : > { %v252_v37 = vmul.bf16 1043676725, %v248_v33  ;;  %v253_v38 = vmul.bf16 1043676725, %v249_v34  ;;  %v771_v40 = vsel %vm424_vm1, %v1755_v36, 0  ;;  %v1756_v41 = vld [vmem:[%s1992_s30 + $0xb0] sm:$0xff]  }
  0x1f   : > { %v1757_v42 = vld [vmem:[%s1992_s30 + $0xf0] sm:$0xff]   ;;  %v661_v43 = vsel %vm424_vm1, %v1756_v41, 0  ;;  %v1758_v45 = vld [vmem:[%s1992_s30 + $0xa8] sm:$0xff]   ;;  %v1760_v49 = vld [vmem:[%s1992_s30 + $0xa0] sm:$0xff]   ;;  %s1438_s27 = sshll.u32 %s1886_s15, 6  ;;  %s1901_s7 = smov [#allocation2]  }
  0x20   : > { %v768_v44 = vsel %vm424_vm1, %v1757_v42, 0  ;;  %v1759_v46 = vld [vmem:[%s1992_s30 + $0xe8] sm:$0xff]   ;;  %v658_v47 = vsel %vm424_vm1, %v1758_v45, 0  ;;  %v1761_v50 = vld [vmem:[%s1992_s30 + $0xe0] sm:$0xff]   ;;  %v655_v51 = vsel %vm424_vm1, %v1760_v49, 0  ;;  %v1762_v53 = vld [vmem:[%s1992_s30 + $0x98] sm:$0xff]   ;;  %s2215_s4 = scalar_lea.hbm %s2261_s3, %s1438_s27 }
  0x21   : > { %1521 = vmatpush3.bf16.xpose.msra.mxu0 %v447_v7  ;;  %v765_v48 = vsel %vm424_vm1, %v1759_v46, 0  ;;  %v762_v52 = vsel %vm424_vm1, %v1761_v50, 0  ;;  %v1763_v54 = vld [vmem:[%s1992_s30 + $0xd8] sm:$0xff]   ;;  %v652_v55 = vsel %vm424_vm1, %v1762_v53, 0  ;;  %v1764_v57 = vld [vmem:[%s1992_s30 + $0x90] sm:$0xff]   ;;  %v1766_v61 = vld [vmem:[%s1992_s30 + $0x88] sm:$0xff]  }
  0x22   : > { %1541 = vmatpush3.bf16.xpose.msra.mxu1 %v554_v8  ;;  %1522 = vmatprep.subr.bf16.mxu0 %v1896_v0  ;;  %v759_v56 = vsel %vm424_vm1, %v1763_v54, 0  ;;  %v1765_v58 = vld [vmem:[%s1992_s30 + $0xd0] sm:$0xff]   ;;  %v649_v59 = vsel %vm424_vm1, %v1764_v57, 0  ;;  %v1767_v62 = vld [vmem:[%s1992_s30 + $0xc8] sm:$0xff]   ;;  %v646_v63 = vsel %vm424_vm1, %v1766_v61, 0  ;;  %v1768_v2 = vld [vmem:[%s1992_s30 + $0x80] sm:$0xff]  }
  0x23   : > { %1542 = vmatprep.subr.bf16.mxu1 %v1896_v0  ;;  %v756_v60 = vsel %vm424_vm1, %v1765_v58, 0  ;;  %v753_v1 = vsel %vm424_vm1, %v1767_v62, 0  ;;  %v1769_v3 = vld [vmem:[%s1992_s30 + $0xc0] sm:$0xff]   ;;  %v643_v4 = vsel %vm424_vm1, %v1768_v2, 0  ;;  %v250_v6 = vld [vmem:[%s2050_s10 + $0x8] sm:$0xf] }
  0x24   : > { %v750_v5 = vsel %vm424_vm1, %v1769_v3, 0  ;;  %v251_v7 = vld [vmem:[%s2050_s10 + $0xc] sm:$0xf]  ;;  %v254_v8 = vmul.bf16 1043676725, %v250_v6  ;;  %v1770_v10 = vld [vmem:[%s2030_s6 + $0x38] sm:$0xff]  }
  0x25   : > { %v255_v9 = vmul.bf16 1043676725, %v251_v7  ;;  %v1774_v13 = vld [vmem:[%s2030_s6 + $0x70] sm:$0xff]   ;;  %v1773_v14 = vld [vmem:[%s2030_s6 + $0x28] sm:$0xff]   ;;  %v1777_v29 = vld [vmem:[%s2030_s6 + $0x18] sm:$0xff]   ;;  %s1822_s15 = sshll.u32 %s1901_s7, 4  ;;  %s1823_s15 = int_to_ptr.vmem [resolvable:$false] %s1822_s15 }
  0x26   : > { %v1778_v30 = vld [vmem:[%s2030_s6 + $0x60] sm:$0xff]   ;;  %v1781_v33 = vld [vmem:[%s2030_s6 + $0x8] sm:$0xff]   ;;  %v1782_v34 = vld [vmem:[%s2030_s6 + $0x50] sm:$0xff]   ;;  %s1824_s8 = scalar_lea.vmem %s1823_s15, 128  ;;  %p1825_p1 = scmp.lt.s32.totalorder %s1258_s28, %s1823_s15 }
  0x27   : > { %v1783_v35 = vld [vmem:[%s2030_s6] sm:$0xff]   ;;  %v1784_v36 = vld [vmem:[%s2030_s6 + $0x48] sm:$0xff]   ;;  %v1787_v58 = vld [vmem:[%s2030_s6 + $0xb0] sm:$0xff]  }
  0x28   : > { %v1789_v61 = vld [vmem:[%s2030_s6 + $0xa8] sm:$0xff]   ;;  %v1790_v62 = vld [vmem:[%s2030_s6 + $0xf0] sm:$0xff]   ;;  %v1793_v2 = vld [vmem:[%s2030_s6 + $0x98] sm:$0xff]  }
  0x29   : > { %1523 = vmatpush3.bf16.xpose.msra.mxu0 %v444_v11  ;;  %v1772_v11 = vld [vmem:[%s2030_s6 + $0x78] sm:$0xff]   ;;  %v1794_v3 = vld [vmem:[%s2030_s6 + $0xe0] sm:$0xff]   ;;  %v1797_v6 = vld [vmem:[%s2030_s6 + $0x88] sm:$0xff]  }
  0x2a   : > { %1543 = vmatpush3.bf16.xpose.msra.mxu1 %v551_v12  ;;  %1524 = vmatprep.subr.bf16.mxu0 %v1896_v0  ;;  %v1771_v12 = vld [vmem:[%s2030_s6 + $0x30] sm:$0xff]  }
  0x2b   : > { %1544 = vmatprep.subr.bf16.mxu1 %v1896_v0  ;;  %v1798_v7 = vld [vmem:[%s2030_s6 + $0xd0] sm:$0xff]  }
  0x31   : > { %1525 = vmatpush3.bf16.xpose.msra.mxu0 %v441_v15  ;;  %v813_v15 = vlaneseq }
  0x32   : > { %1545 = vmatpush3.bf16.xpose.msra.mxu1 %v548_v16  ;;  %1526 = vmatprep.subr.bf16.mxu0 %v1896_v0 }
  0x33   : > { %1546 = vmatprep.subr.bf16.mxu1 %v1896_v0  ;;  %v814_v16 = vand.u32 127, %v813_v15 }
  0x35   : > { %vm815_vm2 = vcmp.lt.s32.totalorder %v814_v16, 16 }
  0x39   : > { %1527 = vmatpush3.bf16.xpose.msra.mxu0 %v438_v23 }
  0x3a   : > { %1547 = vmatpush3.bf16.xpose.msra.mxu1 %v545_v24  ;;  %1528 = vmatprep.subr.bf16.mxu0 %v1896_v0 }
  0x3b   : > { %1548 = vmatprep.subr.bf16.mxu1 %v1896_v0 }
  0x41   : > { %1529 = vmatpush3.bf16.xpose.msra.mxu0 %v435_v25 }
  0x42   : > { %1549 = vmatpush3.bf16.xpose.msra.mxu1 %v542_v26  ;;  %1530 = vmatprep.subr.bf16.mxu0 %v1896_v0 }
  0x43   : > { %1550 = vmatprep.subr.bf16.mxu1 %v1896_v0 }
  0x49   : > { %1531 = vmatpush3.bf16.xpose.msra.mxu0 %v432_v27  ;;  %v1775_v27 = vld [vmem:[%s2030_s6 + $0x20] sm:$0xff]  }
  0x4a   : > { %1551 = vmatpush3.bf16.xpose.msra.mxu1 %v539_v28  ;;  %1532 = vmatprep.subr.bf16.mxu0 %v1896_v0  ;;  %v1776_v28 = vld [vmem:[%s2030_s6 + $0x68] sm:$0xff]  }
  0x4b   : > { %1552 = vmatprep.subr.bf16.mxu1 %v1896_v0 }
  0x51   : > { %1533 = vmatpush3.bf16.xpose.msra.mxu0 %v429_v31  ;;  %v1779_v31 = vld [vmem:[%s2030_s6 + $0x10] sm:$0xff]  }
  0x52   : > { %1553 = vmatpush3.bf16.xpose.msra.mxu1 %v536_v32  ;;  %1558 = vmatprep.subr.bf16.mxu0 %v1896_v0  ;;  %v1780_v32 = vld [vmem:[%s2030_s6 + $0x58] sm:$0xff]  }
  0x53   : > { %1578 = vmatprep.subr.bf16.mxu1 %v1896_v0 }
  0x58   : > { %1535 = vmatmul.mubr.msk.bf16.vlgmr.msra.gmra.mxu0 %vm424_vm1, %v252_v37  ;;  %v1785_v37 = vld [vmem:[%s2030_s6 + $0x40] sm:$0xff]  }
  0x59   : > { %1555 = vmatmul.mubr.msk.bf16.vlgmr.msra.gmra.mxu1 %vm424_vm1, %v253_v38  ;;  %1559 = vmatpush3.bf16.xpose.msra.mxu0 %v664_v39 }
  0x5a   : > { %1579 = vmatpush3.bf16.xpose.msra.mxu1 %v771_v40  ;;  %1560 = vmatprep.subr.bf16.mxu0 %v1896_v0 }
  0x5b   : > { %1580 = vmatprep.subr.bf16.mxu1 %v1896_v0  ;;  %1574 = vmatprep.mubr.msk.bf16.mxu0 %vm1897_vm0, %v1896_v0 }
  0x5c   : > { %1594 = vmatprep.mubr.msk.bf16.mxu1 %vm1897_vm0, %v1896_v0 }
  0x61   : > { %1561 = vmatpush3.bf16.xpose.msra.mxu0 %v661_v43 }
  0x62   : > { %1581 = vmatpush3.bf16.xpose.msra.mxu1 %v768_v44  ;;  %1562 = vmatprep.subr.bf16.mxu0 %v1896_v0 }
  0x63   : > { %1582 = vmatprep.subr.bf16.mxu1 %v1896_v0 }
  0x69   : > { %1563 = vmatpush3.bf16.xpose.msra.mxu0 %v658_v47 }
  0x6a   : > { %1583 = vmatpush3.bf16.xpose.msra.mxu1 %v765_v48  ;;  %1564 = vmatprep.subr.bf16.mxu0 %v1896_v0 }
  0x6b   : > { %1584 = vmatprep.subr.bf16.mxu1 %v1896_v0 }
  0x71   : > { %1565 = vmatpush3.bf16.xpose.msra.mxu0 %v655_v51 }
  0x72   : > { %1585 = vmatpush3.bf16.xpose.msra.mxu1 %v762_v52  ;;  %1566 = vmatprep.subr.bf16.mxu0 %v1896_v0 }
  0x73   : > { %1586 = vmatprep.subr.bf16.mxu1 %v1896_v0 }
  0x79   : > { %1567 = vmatpush3.bf16.xpose.msra.mxu0 %v652_v55  ;;  %v1786_v55 = vld [vmem:[%s2030_s6 + $0xb8] sm:$0xff]  }
  0x7a   : > { %1587 = vmatpush3.bf16.xpose.msra.mxu1 %v759_v56  ;;  %1568 = vmatprep.subr.bf16.mxu0 %v1896_v0 }
  0x7b   : > { %1588 = vmatprep.subr.bf16.mxu1 %v1896_v0 }
  0x81   : > { %1569 = vmatpush3.bf16.xpose.msra.mxu0 %v649_v59  ;;  %v1788_v59 = vld [vmem:[%s2030_s6 + $0xf8] sm:$0xff]  }
  0x82   : > { %1589 = vmatpush3.bf16.xpose.msra.mxu1 %v756_v60  ;;  %1570 = vmatprep.subr.bf16.mxu0 %v1896_v0 }
  0x83   : > { %1590 = vmatprep.subr.bf16.mxu1 %v1896_v0 }
  0x89   : > { %1571 = vmatpush3.bf16.xpose.msra.mxu0 %v646_v63  ;;  %v1791_v63 = vld [vmem:[%s2030_s6 + $0xa0] sm:$0xff]  }
  0x8a   : > { %1591 = vmatpush3.bf16.xpose.msra.mxu1 %v753_v1  ;;  %1572 = vmatprep.subr.bf16.mxu0 %v1896_v0  ;;  %v1792_v1 = vld [vmem:[%s2030_s6 + $0xe8] sm:$0xff]  }
  0x8b   : > { %1592 = vmatprep.subr.bf16.mxu1 %v1896_v0 }
  0x91   : > { %1573 = vmatpush3.bf16.xpose.msra.mxu0 %v643_v4  ;;  %v1795_v4 = vld [vmem:[%s2030_s6 + $0x90] sm:$0xff]  }
  0x92   : > { %1593 = vmatpush3.bf16.xpose.msra.mxu1 %v750_v5  ;;  %1598 = vmatprep.subr.bf16.mxu0 %v1896_v0  ;;  %v1796_v5 = vld [vmem:[%s2030_s6 + $0xd8] sm:$0xff]  }
  0x93   : > { %1618 = vmatprep.subr.bf16.mxu1 %v1896_v0 }
  0x98   : > { %1575 = vmatmul.mubr.msk.bf16.vlgmr.msra.gmra.mxu0 %vm424_vm1, %v254_v8  ;;  %v1799_v8 = vld [vmem:[%s2030_s6 + $0x80] sm:$0xff]  }
  0x99   : > { %1595 = vmatmul.mubr.msk.bf16.vlgmr.msra.gmra.mxu1 %vm424_vm1, %v255_v9  ;;  %1614 = vmatprep.mubr.msk.bf16.mxu0 %vm1897_vm0, %v1896_v0  ;;  %v1800_v9 = vld [vmem:[%s2030_s6 + $0xc8] sm:$0xff]  }
  0x9a   : > { %1634 = vmatprep.mubr.msk.bf16.mxu1 %vm1897_vm0, %v1896_v0  ;;  %1599 = vmatpush3.bf16.msra.mxu0 %v1770_v10  ;;  %v1801_v10 = vld [vmem:[%s2030_s6 + $0xc0] sm:$0xff]   ;;  %s1818_s6 = scalar_lea.vmem %s1258_s28, 64 }
  0x9b   : > { %1619 = vmatpush3.bf16.msra.mxu1 %v1772_v11  ;;  %1600 = vmatprep.subr.bf16.mxu0 %v1896_v0  ;;  %p1819_p12 = scmp.ne.s32.totalorder %s1258_s28, %s1818_s6  ;;  %p1826_p2 = scmp.lt.s32.totalorder %s1824_s8, %s1818_s6 }
  0x9c   : > { %1620 = vmatprep.subr.bf16.mxu1 %v1896_v0 }
  0x9d   : > { %p1820_p13 = pnand %p1819_p12, %p1962_p4  ;;  %p1827_p3 = por %p1826_p2, %p1825_p1 }
  0x9e   : > { %1601 = vmatpush3.bf16.msra.mxu0 %v1771_v12 }
  0x9f   : > { %1621 = vmatpush3.bf16.msra.mxu1 %v1774_v13  ;;  %1602 = vmatprep.subr.bf16.mxu0 %v1896_v0  ;;  %p1821_p0 = pneg %p1820_p13 }
  0xa0   : > { %1622 = vmatprep.subr.bf16.mxu1 %v1896_v0 }
  0xa1   : > { %p1828_p5 = pnand %p1827_p3, %p1821_p0 }
  0xa2   : > { %1603 = vmatpush3.bf16.msra.mxu0 %v1773_v14 }
  0xa3   : > { %1604 = vmatprep.subr.bf16.mxu0 %v1896_v0  ;;  %1623 = vmatpush3.bf16.msra.mxu1 %v1776_v28 }
  0xa4   : > { %1624 = vmatprep.subr.bf16.mxu1 %v1896_v0 }
  0xa6   : > { %1605 = vmatpush3.bf16.msra.mxu0 %v1775_v27 }
  0xa7   : > { %1606 = vmatprep.subr.bf16.mxu0 %v1896_v0  ;;  %1625 = vmatpush3.bf16.msra.mxu1 %v1778_v30 }
  0xa8   : > { %1626 = vmatprep.subr.bf16.mxu1 %v1896_v0 }
  0xaa   : > { %1607 = vmatpush3.bf16.msra.mxu0 %v1777_v29 }
  0xab   : > { %1608 = vmatprep.subr.bf16.mxu0 %v1896_v0  ;;  %1627 = vmatpush3.bf16.msra.mxu1 %v1780_v32 }
  0xac   : > { %1628 = vmatprep.subr.bf16.mxu1 %v1896_v0 }
  0xae   : > { %1609 = vmatpush3.bf16.msra.mxu0 %v1779_v31 }
  0xaf   : > { %1610 = vmatprep.subr.bf16.mxu0 %v1896_v0  ;;  %1629 = vmatpush3.bf16.msra.mxu1 %v1782_v34 }
  0xb0   : > { %1630 = vmatprep.subr.bf16.mxu1 %v1896_v0 }
  0xb2   : > { %1611 = vmatpush3.bf16.msra.mxu0 %v1781_v33 }
  0xb3   : > { %1612 = vmatprep.subr.bf16.mxu0 %v1896_v0  ;;  %1631 = vmatpush3.bf16.msra.mxu1 %v1784_v36 }
  0xb4   : > { %1632 = vmatprep.subr.bf16.mxu1 %v1896_v0 }
  0xb6   : > { %1613 = vmatpush3.bf16.msra.mxu0 %v1783_v35 }
  0xb7   : > { %1638 = vmatprep.subr.bf16.mxu0 %v1896_v0  ;;  %1633 = vmatpush3.bf16.msra.mxu1 %v1785_v37 }
  0xb8   : > { %1658 = vmatprep.subr.bf16.mxu1 %v1896_v0 }
 0x118   : > { %v486_v17 = vpop.f32.mrf.mxu0 }
 0x119   : > { %v593_v18 = vpop.f32.mrf.mxu1  ;;  %v816_v19 = vsel %vm815_vm2, %v486_v17, -1e+30 }
 0x11a   : > { %820 = vmax.xlane.f32.xlu0 %v816_v19  ;;  %v1536_v20 = vpop.f32.mrf.mxu0  ;;  %v817_v22 = vsel %vm815_vm2, %v593_v18, -1e+30 }
 0x11b   : > { %v1556_v21 = vpop.f32.mrf.mxu1 }
 0x11c   : > { %v489_v23 = vpop.f32.mrf.mxu0 }
 0x11d   : > { %v596_v24 = vpop.f32.mrf.mxu1 }
 0x11e   : > { %822 = vmax.xlane.f32.xlu0 %v817_v22  ;;  %v1537_v25 = vpop.f32.mrf.mxu0 }
 0x11f   : > { %v1557_v26 = vpop.f32.mrf.mxu1 }
 0x158   : > { %v700_v38 = vpop.f32.mrf.mxu0 }
 0x159   : > { %v807_v39 = vpop.f32.mrf.mxu1  ;;  %v2154_v40 = vsel %vm815_vm2, %v700_v38, -1e+30 }
 0x15a   : > { %824 = vmax.xlane.f32.xlu1 %v2154_v40  ;;  %v1576_v41 = vpop.f32.mrf.mxu0  ;;  %v2158_v43 = vsel %vm815_vm2, %v807_v39, -1e+30 }
 0x15b   : > { %v1596_v42 = vpop.f32.mrf.mxu1 }
 0x15c   : > { %v703_v44 = vpop.f32.mrf.mxu0 }
 0x15d   : > { %v810_v45 = vpop.f32.mrf.mxu1 }
 0x15e   : > { %826 = vmax.xlane.f32.xlu1 %v2158_v43  ;;  %v1577_v46 = vpop.f32.mrf.mxu0 }
 0x15f   : > { %v1597_v47 = vpop.f32.mrf.mxu1 }
 0x1a3   : > { %v821_v48 = vpop.xlane.xlu0 %820 }
 0x1a4   : > { %v828_v49 = vsub.f32 %v816_v19, %v821_v48 }
 0x1a6   : > { %v832_v50 = vmul.f32 1.442695, %v828_v49 }
 0x1a7   : > { %v823_v51 = vpop.xlane.xlu0 %822 }
 0x1a8   : > { %1802 = vpow2.f32 %v832_v50  ;;  %v829_v52 = vsub.f32 %v817_v22, %v823_v51 }
 0x1aa   : > { %v834_v53 = vmul.f32 1.442695, %v829_v52 }
 0x1ac   : > { %1804 = vpow2.f32 %v834_v53 }
 0x1b5   : > { %v2161_v54 = vpop.eup %1802 }
 0x1b6   : > { %v848_v56 = vpack.c.bf16 %v2161_v54, %v2161_v54 }
 0x1b8   : > { %1615 = vmatmul.mubr.bf16.vlgmr.msra.gmra.mxu0 %v848_v56 }
 0x1b9   : > { %v1805_v57 = vpop.eup %1804  ;;  %1639 = vmatpush3.bf16.msra.mxu0 %v1786_v55  ;;  %1654 = vmatprep.mubr.msk.bf16.mxu0 %vm1897_vm0, %v1896_v0 }
 0x1ba   : > { %842 = vadd.xlane.f32.xlu0 %v1805_v57  ;;  %v849_v60 = vpack.c.bf16 %v1805_v57, %v1805_v57  ;;  %1640 = vmatprep.subr.bf16.mxu0 %v1896_v0 }
 0x1bc   : > { %1635 = vmatmul.mubr.bf16.vlgmr.msra.gmra.mxu1 %v849_v60 }
 0x1bd   : > { %1641 = vmatpush3.bf16.msra.mxu0 %v1787_v58  ;;  %1659 = vmatpush3.bf16.msra.mxu1 %v1788_v59 }
 0x1be   : > { %1642 = vmatprep.subr.bf16.mxu0 %v1896_v0  ;;  %1660 = vmatprep.subr.bf16.mxu1 %v1896_v0 }
 0x1bf   : > { %1674 = vmatprep.mubr.msk.bf16.mxu1 %vm1897_vm0, %v1896_v0 }
 0x1c1   : > { %1643 = vmatpush3.bf16.msra.mxu0 %v1789_v61  ;;  %1661 = vmatpush3.bf16.msra.mxu1 %v1790_v62 }
 0x1c2   : > { %1644 = vmatprep.subr.bf16.mxu0 %v1896_v0  ;;  %1662 = vmatprep.subr.bf16.mxu1 %v1896_v0 }
 0x1c5   : > { %1645 = vmatpush3.bf16.msra.mxu0 %v1791_v63  ;;  %1663 = vmatpush3.bf16.msra.mxu1 %v1792_v1 }
 0x1c6   : > { %1646 = vmatprep.subr.bf16.mxu0 %v1896_v0  ;;  %1664 = vmatprep.subr.bf16.mxu1 %v1896_v0 }
 0x1c9   : > { %1647 = vmatpush3.bf16.msra.mxu0 %v1793_v2  ;;  %1665 = vmatpush3.bf16.msra.mxu1 %v1794_v3 }
 0x1ca   : > { %1648 = vmatprep.subr.bf16.mxu0 %v1896_v0  ;;  %1666 = vmatprep.subr.bf16.mxu1 %v1896_v0 }
 0x1cd   : > { %1649 = vmatpush3.bf16.msra.mxu0 %v1795_v4  ;;  %1667 = vmatpush3.bf16.msra.mxu1 %v1796_v5 }
 0x1ce   : > { %1650 = vmatprep.subr.bf16.mxu0 %v1896_v0  ;;  %1668 = vmatprep.subr.bf16.mxu1 %v1896_v0 }
 0x1d1   : > { %1651 = vmatpush3.bf16.msra.mxu0 %v1797_v6  ;;  %1669 = vmatpush3.bf16.msra.mxu1 %v1798_v7 }
 0x1d2   : > { %1652 = vmatprep.subr.bf16.mxu0 %v1896_v0  ;;  %1670 = vmatprep.subr.bf16.mxu1 %v1896_v0 }
 0x1d5   : > { %1653 = vmatpush3.bf16.msra.mxu0 %v1799_v8  ;;  %1671 = vmatpush3.bf16.msra.mxu1 %v1800_v9 }
 0x1d6   : > { %1672 = vmatprep.subr.bf16.mxu1 %v1896_v0 }
 0x1d9   : > { %1673 = vmatpush3.bf16.msra.mxu1 %v1801_v10 }
 0x1e3   : > { %v825_v11 = vpop.xlane.xlu1 %824 }
 0x1e4   : > { %v830_v12 = vsub.f32 %v2154_v40, %v825_v11 }
 0x1e6   : > { %v836_v13 = vmul.f32 1.442695, %v830_v12 }
 0x1e7   : > { %v827_v14 = vpop.xlane.xlu1 %826 }
 0x1e8   : > { %1806 = vpow2.f32 %v836_v13  ;;  %v831_v15 = vsub.f32 %v2158_v43, %v827_v14 }
 0x1ea   : > { %v838_v16 = vmul.f32 1.442695, %v831_v15 }
 0x1ec   : > { %1808 = vpow2.f32 %v838_v16 }
 0x1f5   : > { %v1807_v17 = vpop.eup %1806 }
 0x1f6   : > { %844 = vadd.xlane.f32.xlu1 %v1807_v17  ;;  %v850_v18 = vpack.c.bf16 %v1807_v17, %v1807_v17 }
 0x1f8   : > { %1655 = vmatmul.mubr.bf16.vlgmr.msra.gmra.mxu0 %v850_v18 }
 0x1f9   : > { %v1809_v19 = vpop.eup %1808 }
 0x1fa   : > { %840 = vadd.xlane.f32.xlu1 %v2161_v54  ;;  %846 = vadd.xlane.f32.xlu0 %v1809_v19  ;;  %v851_v0 = vpack.c.bf16 %v1809_v19, %v1809_v19 }
 0x1fc   : > { %1675 = vmatmul.mubr.bf16.vlgmr.msra.gmra.mxu1 %v851_v0 }
 0x243   : > { %v843_v20 = vpop.xlane.xlu0 %842 }
 0x244   : > { %1810 = vrcp.f32 %v843_v20 }
 0x251   : > { %v1811_v23 = vpop.eup %1810 }
 0x278   : > { %v934_v21 = vpop.f32.mrf.mxu0 }
 0x27a   : > { %v1616_v22 = vpop.f32.mrf.mxu0 }
 0x27c   : > { %v937_v24 = vpop.f32.mrf.mxu0  ;;  %v1022_v25 = vpop.f32.mrf.mxu1 }
 0x27d   : > { %v1209_v26 = vmul.f32 %v1811_v23, %v1022_v25 }
 0x27e   : > { %v1617_v27 = vpop.f32.mrf.mxu0  ;;  %v1636_v28 = vpop.f32.mrf.mxu1 }
 0x27f   : > { %v1443_v29 = vpack.c.bf16 %v1209_v26, %v1209_v26  ;;  %v845_v30 = vpop.xlane.xlu1 %844 }
 0x280   : > { %v1025_v31 = vpop.f32.mrf.mxu1 }
 0x281   : > { %1219 = vrot.lane.b32.xlu0 %v1443_v29, %s1898_s11 }
 0x282   : > { %v1637_v32 = vpop.f32.mrf.mxu1 }
 0x283   : > { %v841_v33 = vpop.xlane.xlu1 %840  ;;  %v847_v37 = vpop.xlane.xlu0 %846 }
 0x284   : > { %1812 = vrcp.f32 %v841_v33 }
 0x285   : > { %1814 = vrcp.f32 %v845_v30 }
 0x286   : > { %1816 = vrcp.f32 %v847_v37 }
 0x291   : > { %v1813_v34 = vpop.eup %1812 }
 0x292   : > { %v1208_v35 = vmul.f32 %v1813_v34, %v934_v21  ;;  %v1815_v38 = vpop.eup %1814 }
 0x293   : > { %v1817_v43 = vpop.eup %1816 }
 0x294   : > { %v1212_v36 = vpack.c.bf16 %v1208_v35, %v1208_v35 }
 0x296   : > { %1214 = vst.msk [vmem:[%s2205_s21] sm:$0xf] %vm1213_vm3, %v1212_v36 }
 0x2b8   : > { %v1110_v39 = vpop.f32.mrf.mxu0 }
 0x2b9   : > { %v1210_v40 = vmul.f32 %v1815_v38, %v1110_v39 }
 0x2ba   : > { %v1656_v41 = vpop.f32.mrf.mxu0 }
 0x2bb   : > { %v1444_v42 = vpack.c.bf16 %v1210_v40, %v1210_v40 }
 0x2bc   : > { %v1113_v44 = vpop.f32.mrf.mxu0  ;;  %v1198_v45 = vpop.f32.mrf.mxu1 }
 0x2bd   : > { %v1211_v46 = vmul.f32 %v1817_v43, %v1198_v45  ;;  %1228 = vrot.lane.b32.xlu1 %v1444_v42, %s1899_s23 }
 0x2be   : > { %v1657_v47 = vpop.f32.mrf.mxu0  ;;  %v1676_v48 = vpop.f32.mrf.mxu1 }
 0x2bf   : > { %v1445_v49 = vpack.c.bf16 %v1211_v46, %v1211_v46 }
 0x2c0   : > { %v1201_v50 = vpop.f32.mrf.mxu1 }
 0x2c1   : > { %1237 = vrot.lane.b32.xlu1 %v1445_v49, %s1900_s26 }
 0x2c2   : > { %v1677_v51 = vpop.f32.mrf.mxu1 }
 0x2f3   : > { %v1220_v52 = vpop.permute.xlu0 %1219 }
 0x2f4   : > { %1223 = vst.msk [vmem:[%s2205_s21] sm:$0xf] %vm1222_vm4, %v1220_v52 }
 0x32f   : > { %v1229_v53 = vpop.permute.xlu1 %1228 }
 0x330   : > { %1232 = vst.msk [vmem:[%s2205_s21] sm:$0xf] %vm1231_vm5, %v1229_v53 }
 0x333   : > { %v1238_v54 = vpop.permute.xlu1 %1237 }
 0x334   : > { %1241 = vst.msk [vmem:[%s2205_s21] sm:$0xf] %vm1240_vm6, %v1238_v54 }
 0x335   : > { %1831 = shalt.err (!%p1828_p5)
}
 0x336   : > { %s1832_s9 = scalar_lea.hbm %s2215_s4, 64  ;;  %s1836_s18 = scalar_lea.hbm %s2261_s3, 128 }
 0x337   : > { %p1833_p6 = scmp.ne.s32.totalorder %s2215_s4, %s1832_s9  ;;  %p1837_p10 = scmp.lt.s32.totalorder %s2215_s4, %s2261_s3 }
 0x338   : > { %p1838_p11 = scmp.lt.s32.totalorder %s1836_s18, %s1832_s9 }
 0x339   : > { %p1834_p7 = pnand %p1833_p6, %p1962_p4 }
 0x33a   : > { %p1839_p12 = por %p1838_p11, %p1837_p10 }
 0x33b   : > { %p1835_p9 = pneg %p1834_p7 }
 0x33d   : > { %p1840_p13 = pnand %p1839_p12, %p1835_p9 }
 0x33f   : > { %1843 = shalt.err (!%p1840_p13)
}
 0x340   : > { %1678 = dma.vmem_to_hbm [thread:$0]  (%p1962_p4), %s1258_s28, 64, %s2215_s4, %s1243_s5  }
 0x341 PF: > { %p1684_p0 = scmp.ge.s32.totalorder %s1894_s17, 2  ;;  %s1269_s23 = sand.u32 1, %s1874_s12  }
 0x342   : > { %s1270_s26 = scalar_lea.sflag [#allocation3], %s1269_s23 }
 0x343   : > { %p1681_p1 = pnand %p1684_p0, %p1969_p8 }
 0x345   : > { %p1682_p2 = pneg %p1681_p1 }
 0x347   : > { %1869 = dma.done.wait (%p1682_p2), %s1270_s26, 64  }
 0x348   : > { %1871 = vsyncadd (%p1682_p2), %s1270_s26, 4294967232  ;;  %s16_s17 = sadd.s32 1, %s1894_s17   ;;  %s2264_s12 = smov %s1878_s13 }
 0x349   : > { %p13_p3 = scmp.ge.s32.totalorder %s16_s17, 4   ;;  %s2265_s13 = smov %s1882_s14 }
 0x34a   : > { %s2266_s14 = smov %s1975_s25  ;;  %s2267_s15 = smov %s1890_s16 }
 0x34b   : > { %s2268_s16 = smov %s2270_s20  ;;  %15 = sbr.rel (!%p13_p3) target bundleno = 4 (0x4), region = 73 }
 0x350   :  { %1275 = vsyncpa [#allocation3], 1 }
 0x351   :  { %1277 = vsyncpa [#allocation3 + $0x1], 1 }

</bundles_post_ra>
